<compile_context>
chip_gen: v7x
topology: tpu7x:2x2x1
jax: 0.10.0
libtpu: 0.0.40
codegen_flags: <defaults>
</compile_context>

<pallas_src>
import functools

import jax
import jax.numpy as jnp
from jax.experimental import pallas as pl
from jax.experimental.pallas import tpu as pltpu

# Static problem config (matches nn.Conv2d(10, 10, 3), stride 1, no padding)
C_IN = 10
C_OUT = 10
KH = KW = 3
K_TAPS = KH * KW * C_IN          # 90
K_EXT = K_TAPS + 1               # +1 ones row carrying the bias


def _conv2d_kernel(x_ref, w_ref, o_ref):
    # x_ref: (1, K_EXT, BT*M_pad)  im2col block, K on sublanes, spatial on lanes
    # w_ref: (C_OUT, K_EXT)        weights with bias as the last column
    # o_ref: (1, C_OUT, BT*M_pad)  lane-dense output block
    o_ref[0] = jnp.dot(
        w_ref[...], x_ref[0], preferred_element_type=jnp.float32
    ).astype(o_ref.dtype)


def _largest_divisor_leq(n, cap):
    for d in range(min(n, max(cap, 1)), 0, -1):
        if n % d == 0:
            return d
    return 1


def _pick_b_tile(n):
    kind = ""
    try:
        kind = jax.devices()[0].device_kind.lower()
    except Exception:
        pass
    if "v7" in kind:
        # 2 TensorCores per chip: keep the grid splittable across both cores.
        return _largest_divisor_leq(n, max(1, n // 2))
    # Single TensorCore (v5e/v6e): fewest grid steps, no padded junk images.
    return _largest_divisor_leq(n, 16)


@functools.partial(jax.jit, static_argnames=("b_tile",))
def conv2d_pallas(x_nchw, w_oihw, bias, *, b_tile=None):
    """Conv2d(C_IN->C_OUT, 3x3), stride 1, no padding.  x_nchw: (N, C_IN, H, W) f32."""
    n, c_in, h, w = x_nchw.shape
    c_out, c_in2, kh_, kw_ = w_oihw.shape
    assert (c_in, c_in2, c_out, kh_, kw_) == (C_IN, C_IN, C_OUT, KH, KW)
    ho, wo = h - KH + 1, w - KW + 1
    m_flat = ho * w                                  # flat output incl. junk cols
    m_pad = ((m_flat + 127) // 128) * 128            # lane-aligned per-image slab

    if b_tile is None:
        b_tile = _pick_b_tile(n)
    n_pad = (-n) % b_tile
    n_full = n + n_pad
    n_blocks = n_full // b_tile

    # ---- XLA-side im2col prep (tiny, fused under jit) -----------------------
    # NCHW -> (N, C_IN, H*W) is a free reshape; pad flat spatial by KW-1 so all
    # tap windows stay in bounds (padded values only feed junk columns).
    x_cs = x_nchw.reshape(n, C_IN, h * w)
    x_cs = jnp.pad(x_cs, ((0, 0), (0, 0), (0, KW - 1)))
    taps = [x_cs[:, :, kh * w + kw: kh * w + kw + m_flat]
            for kh in range(KH) for kw in range(KW)]          # each (N, C_IN, HO*W)
    x_i2c = jnp.stack(taps, axis=1).reshape(n, K_TAPS, m_flat)
    # Pad batch (junk images) and lanes (224 -> 256), append the ones row.
    x_i2c = jnp.pad(x_i2c, ((0, n_pad), (0, 0), (0, m_pad - m_flat)))
    ones_row = jnp.ones((n_full, 1, m_pad), x_i2c.dtype)
    x_ext = jnp.concatenate([x_i2c, ones_row], axis=1)        # (n_full, 91, m_pad)
    # Group b_tile images per block with per-image slabs along the lane axis.
    x_blk = (x_ext.reshape(n_blocks, b_tile, K_EXT, m_pad)
                  .transpose(0, 2, 1, 3)
                  .reshape(n_blocks, K_EXT, b_tile * m_pad))

    # Weights: OIHW -> (C_OUT, K) with k = (kh*KW + kw)*C_IN + c_in; bias as
    # the extra last column (matches the ones row in the im2col).
    w_flat = jnp.transpose(w_oihw, (0, 2, 3, 1)).reshape(C_OUT, K_TAPS)
    w_ext = jnp.concatenate(
        [w_flat, bias.reshape(C_OUT, 1)], axis=1).astype(jnp.float32)

    out_blk = pl.pallas_call(
        _conv2d_kernel,
        out_shape=jax.ShapeDtypeStruct((n_blocks, C_OUT, b_tile * m_pad),
                                       x_nchw.dtype),
        grid_spec=pltpu.PrefetchScalarGridSpec(
            num_scalar_prefetch=0,
            grid=(n_blocks,),
            in_specs=[
                pl.BlockSpec((1, K_EXT, b_tile * m_pad), lambda i: (i, 0, 0)),
                pl.BlockSpec((C_OUT, K_EXT), lambda i: (0, 0)),
            ],
            out_specs=pl.BlockSpec((1, C_OUT, b_tile * m_pad),
                                   lambda i: (i, 0, 0)),
        ),
        compiler_params=pltpu.CompilerParams(
            dimension_semantics=("parallel",)),
    )(x_blk, w_ext)

    # Un-block, drop lane padding / junk columns / padded images.
    out = (out_blk.reshape(n_blocks, C_OUT, b_tile, m_pad)
                  .transpose(0, 2, 1, 3)
                  .reshape(n_full, C_OUT, m_pad))
    out = out[:n, :, :m_flat].reshape(n, C_OUT, ho, w)[:, :, :, :wo]
    return out


def _init_params(key):
    # Deterministic init mimicking nn.Conv2d defaults (uniform +/- 1/sqrt(fan_in)).
    kw_, kb_ = jax.random.split(key)
    fan_in = C_IN * KH * KW
    bound = 1.0 / (fan_in ** 0.5)
    w = jax.random.uniform(kw_, (C_OUT, C_IN, KH, KW), jnp.float32, -bound, bound)
    b = jax.random.uniform(kb_, (C_OUT,), jnp.float32, -bound, bound)
    return w, b


if __name__ == "__main__":
    key = jax.random.PRNGKey(0)
    k_x, k_p = jax.random.split(key)

    # Small example consistent with the module: N=2, C=10, H=W=16 -> out 14x14
    x = jax.random.normal(k_x, (2, C_IN, 16, 16), dtype=jnp.float32)
    w, b = _init_params(k_p)

    out = jax.block_until_ready(conv2d_pallas(x, w, b))

    # Reference check against XLA's conv (NCHW / OIHW)
    ref = jax.lax.conv_general_dilated(
        x, w, window_strides=(1, 1), padding="VALID",
        dimension_numbers=("NCHW", "OIHW", "NCHW"))
    ref = ref + b.reshape(1, C_OUT, 1, 1)

    assert out.shape == (2, C_OUT, 14, 14)
    assert jnp.allclose(out, ref, atol=1e-4, rtol=1e-4)

    print("KERNEL_OK")
</pallas_src>

<mosaic_0001>
module attributes {stable_mosaic.version = 11 : i64} {
  func.func @_conv2d_kernel(%arg0: i32, %arg1: memref<1x91x512xf32, #tpu.memory_space<vmem>>, %arg2: memref<10x91xf32, #tpu.memory_space<vmem>>, %arg3: memref<1x10x512xf32, #tpu.memory_space<vmem>>) attributes {dimension_semantics = [#tpu.dimension_semantics<parallel>], iteration_bounds = array<i64: 1>, scalar_prefetch = 0 : i64, scratch_operands = 0 : i64, tpu.core_type = #tpu.core_type<tc>, window_params = [{transform_indices = @transform_0, window_bounds = array<i64: 1, 91, 512>}, {pipeline_mode = #tpu.pipeline_mode<synchronous>, transform_indices = @transform_1, window_bounds = array<i64: 10, 91>}, {transform_indices = @transform_2, window_bounds = array<i64: 1, 10, 512>}]} {
    %c0 = arith.constant 0 : index
    %c0_0 = arith.constant 0 : index
    %0 = vector.load %arg2[%c0, %c0_0] : memref<10x91xf32, #tpu.memory_space<vmem>>, vector<10x91xf32>
    %c0_1 = arith.constant 0 : index
    %c0_2 = arith.constant 0 : index
    %c0_3 = arith.constant 0 : index
    %1 = vector.load %arg1[%c0_1, %c0_2, %c0_3] : memref<1x91x512xf32, #tpu.memory_space<vmem>>, vector<1x91x512xf32>
    %2 = vector.shape_cast %1 : vector<1x91x512xf32> to vector<91x512xf32>
    %cst = arith.constant dense<0.000000e+00> : vector<10x512xf32>
    %3 = tpu.matmul %0, %2, %cst {dimension_numbers = #tpu.dot_dimension_numbers<[1], [0], [0], [1], [0, 0, 1, 1], [], []>} : vector<10x91xf32>, vector<91x512xf32>, vector<10x512xf32> -> vector<10x512xf32>
    %c0_4 = arith.constant 0 : index
    %c0_5 = arith.constant 0 : index
    %c0_6 = arith.constant 0 : index
    %4 = vector.load %arg3[%c0_4, %c0_5, %c0_6] : memref<1x10x512xf32, #tpu.memory_space<vmem>>, vector<1x10x512xf32>
    %5 = vector.shape_cast %4 : vector<1x10x512xf32> to vector<10x512xf32>
    %6 = vector.shape_cast %3 : vector<10x512xf32> to vector<1x10x512xf32>
    tpu.vector_store %arg3[%c0_4, %c0_5, %c0_6], %6 {strides = array<i32>} : memref<1x10x512xf32, #tpu.memory_space<vmem>>, vector<1x10x512xf32>,
    return
  }
  func.func @transform_0(%arg0: i32) -> (i32, i32, i32) {
    %c0_i32 = arith.constant 0 : i32
    %c0_i32_0 = arith.constant 0 : i32
    %c0_i32_1 = arith.constant 0 : i32
    return %arg0, %c0_i32, %c0_i32_0 : i32, i32, i32
  }
  func.func @transform_1(%arg0: i32) -> (i32, i32) {
    %c0_i32 = arith.constant 0 : i32
    %c0_i32_0 = arith.constant 0 : i32
    %c0_i32_1 = arith.constant 0 : i32
    return %c0_i32, %c0_i32_0 : i32, i32
  }
  func.func @transform_2(%arg0: i32) -> (i32, i32, i32) {
    %c0_i32 = arith.constant 0 : i32
    %c0_i32_0 = arith.constant 0 : i32
    %c0_i32_1 = arith.constant 0 : i32
    return %arg0, %c0_i32, %c0_i32_0 : i32, i32, i32
  }
}

</mosaic_0001>

<bundles_post_ra>
// kernel: conv2d_pallas.1
= control target key start
LH: loop header
LB: loop body
LE: loop exit
PB: predicated region body
PF: predicated region fallthrough
CT: control target
= control target key end

     0   :  { %v309_v3 = vmov 0.0   ;;  %vm68_vm0 = vcmask 1042432   ;;  %vm310_vm1 = vmmov 1   ;;  %vm61_vm3 = vcmask 744448   ;;  %s504_s0 = inlined_call_operand.vmem [shape: f32[1,91,512], index: 0, kind: input, shape index: {}]   ;;  %s505_s1 = inlined_call_operand.vmem [shape: f32[10,91], index: 1, kind: input, shape index: {}]   ;;  %s506_s2 = inlined_call_operand.vmem [shape: f32[1,10,512], index: 2, kind: output, shape index: {}]  }
   0x1   :  { %v14_v0 = vld [vmem:[%s504_s0 + $0x8] sm:$0xff]  ;;  %v16_v2 = vld [vmem:[%s504_s0 + $0x18] sm:$0xff]  ;;  %145 = vmatprep.mubr.f32.mxu0 %v309_v3  ;;  %222 = vmatprep.mubr.f32.mxu1 %v309_v3  ;;  %v13_v6 = vld [vmem:[%s504_s0] sm:$0xff] }
   0x2   :  { %v18_v1 = vld [vmem:[%s504_s0 + $0x28] sm:$0xff]  ;;  %v20_v5 = vld [vmem:[%s504_s0 + $0x38] sm:$0xff]  ;;  %v17_v7 = vld [vmem:[%s504_s0 + $0x20] sm:$0xff] }
   0x3   :  { %v255_v4 = vpack.c.bf16 %v18_v1, %v14_v0  ;;  %v281_v8 = vpack.c.bf16 %v20_v5, %v16_v2  ;;  %v257_v9 = vpack.c.bf16 %v17_v7, %v13_v6  ;;  %v15_v10 = vld [vmem:[%s504_s0 + $0x10] sm:$0xff]  ;;  %v22_v12 = vld [vmem:[%s504_s0 + $0x48] sm:$0xff]  ;;  %v24_v15 = vld [vmem:[%s504_s0 + $0x58] sm:$0xff] }
   0x4   :  { %v19_v11 = vld [vmem:[%s504_s0 + $0x30] sm:$0xff]  ;;  %v26_v14 = vld [vmem:[%s504_s0 + $0x68] sm:$0xff]  ;;  %v28_v16 = vld [vmem:[%s504_s0 + $0x78] sm:$0xff] }
   0x5   :  { %256 = vmatprep.subr.bf16.mxu0 %v255_v4  ;;  %v283_v13 = vpack.c.bf16 %v19_v11, %v15_v10  ;;  %282 = vmatprep.subr.bf16.mxu1 %v281_v8  ;;  %v259_v17 = vpack.c.bf16 %v26_v14, %v22_v12  ;;  %v285_v18 = vpack.c.bf16 %v28_v16, %v24_v15  ;;  %v21_v19 = vld [vmem:[%s504_s0 + $0x40] sm:$0xff]  ;;  %v23_v21 = vld [vmem:[%s504_s0 + $0x50] sm:$0xff]  ;;  %v30_v24 = vld [vmem:[%s504_s0 + $0x88] sm:$0xff] }
   0x6   :  { %258 = vmatpush1.bf16.msra.mxu0 %v257_v9  ;;  %v25_v20 = vld [vmem:[%s504_s0 + $0x60] sm:$0xff]  ;;  %v27_v23 = vld [vmem:[%s504_s0 + $0x70] sm:$0xff]  ;;  %v34_v25 = vld [vmem:[%s504_s0 + $0xa8] sm:$0xff] }
   0x7   :  { %284 = vmatpush1.bf16.msra.mxu1 %v283_v13  ;;  %v261_v22 = vpack.c.bf16 %v25_v20, %v21_v19  ;;  %260 = vmatprep.subr.bf16.mxu0 %v259_v17  ;;  %v287_v26 = vpack.c.bf16 %v27_v23, %v23_v21  ;;  %v263_v27 = vpack.c.bf16 %v34_v25, %v30_v24  ;;  %v32_v28 = vld [vmem:[%s504_s0 + $0x98] sm:$0xff]  ;;  %v29_v30 = vld [vmem:[%s504_s0 + $0x80] sm:$0xff]  ;;  %v31_v33 = vld [vmem:[%s504_s0 + $0x90] sm:$0xff] }
   0x8   :  { %286 = vmatprep.subr.bf16.mxu1 %v285_v18  ;;  %v36_v29 = vld [vmem:[%s504_s0 + $0xb8] sm:$0xff]  ;;  %v33_v32 = vld [vmem:[%s504_s0 + $0xa0] sm:$0xff]  ;;  %v35_v34 = vld [vmem:[%s504_s0 + $0xb0] sm:$0xff] }
   0x9   :  { %v289_v31 = vpack.c.bf16 %v36_v29, %v32_v28  ;;  %v265_v35 = vpack.c.bf16 %v33_v32, %v29_v30  ;;  %v38_v36 = vld [vmem:[%s504_s0 + $0xc8] sm:$0xff]  ;;  %v40_v38 = vld [vmem:[%s504_s0 + $0xd8] sm:$0xff]  ;;  %v291_v39 = vpack.c.bf16 %v35_v34, %v31_v33  ;;  %v37_v42 = vld [vmem:[%s504_s0 + $0xc0] sm:$0xff] }
   0xa   :  { %262 = vmatpush1.bf16.msra.mxu0 %v261_v22  ;;  %v42_v37 = vld [vmem:[%s504_s0 + $0xe8] sm:$0xff]  ;;  %v44_v41 = vld [vmem:[%s504_s0 + $0xf8] sm:$0xff]  ;;  %v41_v43 = vld [vmem:[%s504_s0 + $0xe0] sm:$0xff] }
   0xb   :  { %288 = vmatpush1.bf16.msra.mxu1 %v287_v26  ;;  %264 = vmatprep.subr.bf16.mxu0 %v263_v27  ;;  %v267_v40 = vpack.c.bf16 %v42_v37, %v38_v36  ;;  %v293_v44 = vpack.c.bf16 %v44_v41, %v40_v38  ;;  %v39_v45 = vld [vmem:[%s504_s0 + $0xd0] sm:$0xff]  ;;  %v46_v47 = vld [vmem:[%s504_s0 + $0x108] sm:$0xff]  ;;  %v48_v49 = vld [vmem:[%s504_s0 + $0x118] sm:$0xff]  ;;  %v269_v51 = vpack.c.bf16 %v41_v43, %v37_v42 }
   0xc   :  { %290 = vmatprep.subr.bf16.mxu1 %v289_v31  ;;  %v43_v46 = vld [vmem:[%s504_s0 + $0xf0] sm:$0xff]  ;;  %v50_v48 = vld [vmem:[%s504_s0 + $0x128] sm:$0xff]  ;;  %v52_v50 = vld [vmem:[%s504_s0 + $0x138] sm:$0xff] }
   0xd   :  { %v295_v52 = vpack.c.bf16 %v43_v46, %v39_v45  ;;  %v271_v53 = vpack.c.bf16 %v50_v48, %v46_v47  ;;  %v45_v54 = vld [vmem:[%s504_s0 + $0x100] sm:$0xff]  ;;  %v47_v56 = vld [vmem:[%s504_s0 + $0x110] sm:$0xff]  ;;  %v297_v57 = vpack.c.bf16 %v52_v50, %v48_v49  ;;  %v54_v59 = vld [vmem:[%s504_s0 + $0x148] sm:$0xff] }
   0xe   :  { %266 = vmatpush1.bf16.msra.mxu0 %v265_v35  ;;  %v49_v55 = vld [vmem:[%s504_s0 + $0x120] sm:$0xff]  ;;  %v51_v58 = vld [vmem:[%s504_s0 + $0x130] sm:$0xff]  ;;  %v58_v60 = vld [vmem:[%s504_s0 + $0x168] sm:$0x7] }
   0xf   :  { %292 = vmatpush1.bf16.msra.mxu1 %v291_v39  ;;  %268 = vmatprep.subr.bf16.mxu0 %v267_v40  ;;  %v56_v61 = vld [vmem:[%s504_s0 + $0x158] sm:$0xff]  ;;  %v273_v63 = vpack.c.bf16 %v49_v55, %v45_v54  ;;  %v299_v0 = vpack.c.bf16 %v51_v58, %v47_v56  ;;  %v275_v1 = vpack.c.bf16 %v58_v60, %v54_v59  ;;  %v53_v2 = vld [vmem:[%s504_s0 + $0x140] sm:$0xff]  ;;  %vm276_vm2 = vmpackc.low %vm68_vm0, %vm310_vm1 }
  0x10   :  { %294 = vmatprep.subr.bf16.mxu1 %v293_v44  ;;  %v60_v62 = vld [vmem:[%s504_s0 + $0x178] sm:$0x7]  ;;  %v57_v4 = vld [vmem:[%s504_s0 + $0x160] sm:$0x7]  ;;  %v55_v6 = vld [vmem:[%s504_s0 + $0x150] sm:$0xff] }
  0x11   :  { %v301_v5 = vpack.c.bf16 %v60_v62, %v56_v61  ;;  %v59_v7 = vld [vmem:[%s504_s0 + $0x170] sm:$0x7]  ;;  %v278_v8 = vpack.c.bf16 %v57_v4, %v53_v2  ;;  %v11_v10 = vld [vmem:[%s505_s1] sm:$0xff]  ;;  %v12_v11 = vld [vmem:[%s505_s1 + $0x8] sm:$0x3] }
  0x12   :  { %270 = vmatpush1.bf16.msra.mxu0 %v269_v51  ;;  %v304_v9 = vpack.c.bf16 %v59_v7, %v55_v6 }
  0x13   :  { %296 = vmatpush1.bf16.msra.mxu1 %v295_v52  ;;  %272 = vmatprep.subr.bf16.mxu0 %v271_v53 }
  0x14   :  { %298 = vmatprep.subr.bf16.mxu1 %v297_v57 }
  0x16   :  { %274 = vmatpush1.bf16.msra.mxu0 %v273_v63 }
  0x17   :  { %300 = vmatpush1.bf16.msra.mxu1 %v299_v0  ;;  %277 = vmatprep.subr.msk.bf16.mxu0 %vm276_vm2, %v275_v1 }
  0x18   :  { %303 = vmatprep.subr.msk.bf16.mxu1 %vm276_vm2, %v301_v5 }
  0x1a   :  { %280 = vmatpush1.bf16.msk.msra.mxu0 %vm276_vm2, %v278_v8 }
  0x1b   :  { %306 = vmatpush1.bf16.msk.msra.mxu1 %vm276_vm2, %v304_v9 }
  0x1d   :  { %249 = vmatmul.mubr.msk.f32.vlgmr.msra.gmra.mrb[0].mxu0 %vm61_vm3, %v11_v10 }
  0x1e   :  { %253 = vmatmul.mubr.msk.f32.vlgmr.msra.gmra.mrb[0].mxu1 %vm61_vm3, %v11_v10  ;;  %151 = vmatprep.mubr.f32.mxu0 %v309_v3 }
  0x1f   :  { %228 = vmatprep.mubr.f32.mxu1 %v309_v3 }
  0x21   :  { %250 = vmatmul.mubr.msk.f32.gmra.mrb[2].mxu0 %vm61_vm3, %v12_v11 }
  0x22   :  { %254 = vmatmul.mubr.msk.f32.gmra.mrb[2].mxu1 %vm61_vm3, %v12_v11 }
  0xf0   :  { %v147_v12 = vpop.f32.mrb[0].mxu0 }
  0xf1   :  { %235 = vst [vmem:[%s506_s2] sm:$0xff] %v147_v12  ;;  %v224_v13 = vpop.f32.mrb[0].mxu1  ;;  %v149_v14 = vpop.f32.mrb[1].mxu0 }
  0xf2   :  { %237 = vst [vmem:[%s506_s2 + $0x10] sm:$0xff] %v224_v13  ;;  %236 = vst [vmem:[%s506_s2 + $0x8] sm:$0xff] %v149_v14  ;;  %v226_v15 = vpop.f32.mrb[1].mxu1 }
  0xf3   :  { %238 = vst [vmem:[%s506_s2 + $0x18] sm:$0xff] %v226_v15 }
  0xf4   :  { %v153_v3 = vpop.f32.mrb[2].mxu0 }
  0xf5   :  { %239 = vst [vmem:[%s506_s2 + $0x20] sm:$0x3] %v153_v3  ;;  %v230_v16 = vpop.f32.mrb[2].mxu1  ;;  %v155_v17 = vpop.f32.mrb[3].mxu0 }
  0xf6   :  { %241 = vst [vmem:[%s506_s2 + $0x30] sm:$0x3] %v230_v16  ;;  %240 = vst [vmem:[%s506_s2 + $0x28] sm:$0x3] %v155_v17  ;;  %v232_v18 = vpop.f32.mrb[3].mxu1 }
  0xf7   :  { %242 = vst [vmem:[%s506_s2 + $0x38] sm:$0x3] %v232_v18 }

</bundles_post_ra>
